<compile_context>
chip_gen: v5e
topology: v5e:2x2
jax: 0.10.0
libtpu: 0.0.40
codegen_flags: <defaults>
</compile_context>

<pallas_src>
import jax
import jax.numpy as jnp
from jax.experimental import pallas as pl
from jax.experimental.pallas import tpu as pltpu

_BN_EPS = 1e-5


# ---------------- fused Pallas kernel ----------------

def _build_fused_kernel(n_hidden):
    """Kernel over refs: (x, [w_i, gamma_i, beta_i]*n_hidden, w_out, b_out, o)."""

    def kernel(*refs):
        x_ref = refs[0]
        o_ref = refs[-1]

        h = x_ref[...]  # (B, Din) f32
        idx = 1
        for _ in range(n_hidden):
            w_ref, g_ref, be_ref = refs[idx:idx + 3]
            idx += 3
            # bf16 operands -> MXU; accumulate in f32.
            y = jnp.dot(h.astype(jnp.bfloat16), w_ref[...],
                        preferred_element_type=jnp.float32)
            # NOTE: hidden Linear bias intentionally omitted — training-mode BN's mean
            # subtraction cancels any per-feature constant exactly.
            mean = jnp.mean(y, axis=0, keepdims=True)
            diff = y - mean
            var = jnp.mean(diff * diff, axis=0, keepdims=True)
            # Folded BN affine: gamma folded into the rsqrt scale (rsqrt is on the EUP).
            scale = g_ref[...] * jax.lax.rsqrt(var + _BN_EPS)
            h = jnp.maximum(diff * scale + be_ref[...], 0.0)  # ReLU

        w_out_ref, b_out_ref = refs[idx], refs[idx + 1]
        logits = jnp.dot(h.astype(jnp.bfloat16), w_out_ref[...],
                         preferred_element_type=jnp.float32) + b_out_ref[...]
        # Explicit sigmoid (exp on the EUP, f32 elementwise math).
        o_ref[...] = 1.0 / (1.0 + jnp.exp(-logits))

    return kernel


# ---------------- wrapper ----------------

def _full_spec(shape):
    # Full-array block for a grid of (1,).
    return pl.BlockSpec(shape, lambda i, n=len(shape): (0,) * n)


def fused_discriminator_forward(x, hidden_layers, w_out, b_out):
    """hidden_layers: tuple of (w_bf16 (Din,H), gamma (1,H), beta (1,H));
       w_out: (H_last, Dout) bf16; b_out: (1, Dout) f32."""
    B = x.shape[0]
    Dout = w_out.shape[1]
    n_hidden = len(hidden_layers)

    args = [x]
    in_specs = [_full_spec(x.shape)]
    flops = 0
    transcendentals = 0
    bytes_accessed = x.size * x.dtype.itemsize

    for (w, g, be) in hidden_layers:
        args += [w, g, be]
        in_specs += [_full_spec(w.shape), _full_spec(g.shape), _full_spec(be.shape)]
        flops += 2 * B * w.shape[0] * w.shape[1]
        transcendentals += w.shape[1]  # rsqrt per feature
        bytes_accessed += (w.size * w.dtype.itemsize
                           + g.size * g.dtype.itemsize
                           + be.size * be.dtype.itemsize)

    args += [w_out, b_out]
    in_specs += [_full_spec(w_out.shape), _full_spec(b_out.shape)]
    flops += 2 * B * w_out.shape[0] * Dout
    transcendentals += B * Dout  # sigmoid exp
    bytes_accessed += (w_out.size * w_out.dtype.itemsize
                       + b_out.size * b_out.dtype.itemsize
                       + B * Dout * 4)

    return pl.pallas_call(
        _build_fused_kernel(n_hidden),
        out_shape=jax.ShapeDtypeStruct((B, Dout), jnp.float32),
        grid=(1,),
        in_specs=in_specs,
        out_specs=_full_spec((B, Dout)),
        compiler_params=pltpu.CompilerParams(dimension_semantics=("arbitrary",)),
        cost_estimate=pl.CostEstimate(flops=flops,
                                      transcendentals=transcendentals,
                                      bytes_accessed=bytes_accessed),
    )(*args)


# ---------------- model: parameter init + forward ----------------

def init_discriminator_fc(key, input_size, hidden_sizes, output_size):
    """Deterministic synthetic parameters (PyTorch-like uniform fan-in init).
    Returns a pure-array pytree (jit-friendly)."""
    hidden = []
    prev = input_size
    for h in hidden_sizes:
        key, kw, kb = jax.random.split(key, 3)
        bound = 1.0 / (float(prev) ** 0.5)
        w = jax.random.uniform(kw, (prev, h), jnp.float32, -bound, bound)   # (in, out)
        b = jax.random.uniform(kb, (1, h), jnp.float32, -bound, bound)      # canceled by BN
        gamma = jnp.ones((1, h), jnp.float32)   # BatchNorm1d weight init
        beta = jnp.zeros((1, h), jnp.float32)   # BatchNorm1d bias init
        hidden.append({"w": w, "b": b, "gamma": gamma, "beta": beta})
        prev = h
    key, kw, kb = jax.random.split(key, 3)
    bound = 1.0 / (float(prev) ** 0.5)
    w = jax.random.uniform(kw, (prev, output_size), jnp.float32, -bound, bound)
    b = jax.random.uniform(kb, (1, output_size), jnp.float32, -bound, bound)
    return {"hidden": tuple(hidden), "out": {"w": w, "b": b}}


@jax.jit
def discriminator_fc_forward(x, params):
    hidden_layers = tuple(
        (layer["w"].astype(jnp.bfloat16), layer["gamma"], layer["beta"])
        for layer in params["hidden"]
    )
    w_out = params["out"]["w"].astype(jnp.bfloat16)
    b_out = params["out"]["b"]
    out = fused_discriminator_forward(x, hidden_layers, w_out, b_out)
    return out.reshape(-1, 1)  # out.view(-1, 1)


# ---------------- pure-JAX reference (correctness check) ----------------

def _ref_forward(x, params):
    out = x
    for layer in params["hidden"]:
        y = out @ layer["w"] + layer["b"]
        mean = jnp.mean(y, axis=0, keepdims=True)
        var = jnp.mean((y - mean) ** 2, axis=0, keepdims=True)
        y = (y - mean) / jnp.sqrt(var + _BN_EPS) * layer["gamma"] + layer["beta"]
        out = jnp.maximum(y, 0.0)
    y = out @ params["out"]["w"] + params["out"]["b"]
    out = 1.0 / (1.0 + jnp.exp(-y))
    return out.reshape(-1, 1)


if __name__ == "__main__":
    input_size = 32
    hidden_sizes = (64, 32)
    output_size = 1
    batch = 8

    key = jax.random.PRNGKey(0)
    key, kx = jax.random.split(key)
    x = jax.random.normal(kx, (batch, input_size), jnp.float32)

    params = init_discriminator_fc(key, input_size, hidden_sizes, output_size)

    out = discriminator_fc_forward(x, params)
    out = jax.block_until_ready(out)

    ref = _ref_forward(x, params)
    assert out.shape == (batch * output_size, 1), out.shape
    # bf16 MXU operands vs f32 reference -> loose tolerance (sigmoid output in (0,1)).
    assert jnp.allclose(out, ref, atol=2e-2, rtol=2e-2), "mismatch vs reference"

    print("KERNEL_OK")
</pallas_src>

<mosaic_0001>
module attributes {stable_mosaic.version = 11 : i64} {
  func.func @kernel(%arg0: i32, %arg1: memref<8x32xf32, #tpu.memory_space<vmem>>, %arg2: memref<32x64xbf16, #tpu.memory_space<vmem>>, %arg3: memref<1x64xf32, #tpu.memory_space<vmem>>, %arg4: memref<1x64xf32, #tpu.memory_space<vmem>>, %arg5: memref<64x32xbf16, #tpu.memory_space<vmem>>, %arg6: memref<1x32xf32, #tpu.memory_space<vmem>>, %arg7: memref<1x32xf32, #tpu.memory_space<vmem>>, %arg8: memref<32x1xbf16, #tpu.memory_space<vmem>>, %arg9: memref<1x1xf32, #tpu.memory_space<vmem>>, %arg10: memref<8x1xf32, #tpu.memory_space<vmem>>) attributes {dimension_semantics = [#tpu.dimension_semantics<arbitrary>], iteration_bounds = array<i64: 1>, scalar_prefetch = 0 : i64, scratch_operands = 0 : i64, tpu.core_type = #tpu.core_type<tc>, window_params = [{pipeline_mode = #tpu.pipeline_mode<synchronous>, transform_indices = @transform_0, window_bounds = array<i64: 8, 32>}, {pipeline_mode = #tpu.pipeline_mode<synchronous>, transform_indices = @transform_1, window_bounds = array<i64: 32, 64>}, {pipeline_mode = #tpu.pipeline_mode<synchronous>, transform_indices = @transform_2, window_bounds = array<i64: 1, 64>}, {pipeline_mode = #tpu.pipeline_mode<synchronous>, transform_indices = @transform_3, window_bounds = array<i64: 1, 64>}, {pipeline_mode = #tpu.pipeline_mode<synchronous>, transform_indices = @transform_4, window_bounds = array<i64: 64, 32>}, {pipeline_mode = #tpu.pipeline_mode<synchronous>, transform_indices = @transform_5, window_bounds = array<i64: 1, 32>}, {pipeline_mode = #tpu.pipeline_mode<synchronous>, transform_indices = @transform_6, window_bounds = array<i64: 1, 32>}, {pipeline_mode = #tpu.pipeline_mode<synchronous>, transform_indices = @transform_7, window_bounds = array<i64: 32, 1>}, {pipeline_mode = #tpu.pipeline_mode<synchronous>, transform_indices = @transform_8, window_bounds = array<i64: 1, 1>}, {pipeline_mode = #tpu.pipeline_mode<synchronous>, transform_indices = @transform_9, window_bounds = array<i64: 8, 1>}]} {
    %c0 = arith.constant 0 : index
    %c0_0 = arith.constant 0 : index
    %0 = vector.load %arg1[%c0, %c0_0] : memref<8x32xf32, #tpu.memory_space<vmem>>, vector<8x32xf32>
    %1 = arith.truncf %0 : vector<8x32xf32> to vector<8x32xbf16>
    %c0_1 = arith.constant 0 : index
    %c0_2 = arith.constant 0 : index
    %2 = vector.load %arg2[%c0_1, %c0_2] : memref<32x64xbf16, #tpu.memory_space<vmem>>, vector<32x64xbf16>
    %cst = arith.constant dense<0.000000e+00> : vector<8x64xf32>
    %3 = tpu.matmul %1, %2, %cst {dimension_numbers = #tpu.dot_dimension_numbers<[1], [0], [0], [1], [0, 0, 1, 1], [], []>} : vector<8x32xbf16>, vector<32x64xbf16>, vector<8x64xf32> -> vector<8x64xf32>
    %cst_3 = arith.constant dense<0.000000e+00> : vector<64xf32>
    %4 = vector.multi_reduction <add>, %3, %cst_3 [0] : vector<8x64xf32> to vector<64xf32>
    %5 = vector.shape_cast %4 : vector<64xf32> to vector<1x64xf32>
    %cst_4 = arith.constant 8.000000e+00 : f32
    %6 = vector.broadcast %cst_4 : f32 to vector<1x64xf32>
    %7 = arith.divf %5, %6 : vector<1x64xf32>
    %8 = vector.broadcast %7 : vector<1x64xf32> to vector<8x64xf32>
    %9 = arith.subf %3, %8 : vector<8x64xf32>
    %10 = arith.mulf %9, %9 : vector<8x64xf32>
    %cst_5 = arith.constant dense<0.000000e+00> : vector<64xf32>
    %11 = vector.multi_reduction <add>, %10, %cst_5 [0] : vector<8x64xf32> to vector<64xf32>
    %12 = vector.shape_cast %11 : vector<64xf32> to vector<1x64xf32>
    %cst_6 = arith.constant 8.000000e+00 : f32
    %13 = vector.broadcast %cst_6 : f32 to vector<1x64xf32>
    %14 = arith.divf %12, %13 : vector<1x64xf32>
    %c0_7 = arith.constant 0 : index
    %c0_8 = arith.constant 0 : index
    %15 = vector.load %arg3[%c0_7, %c0_8] : memref<1x64xf32, #tpu.memory_space<vmem>>, vector<1x64xf32>
    %cst_9 = arith.constant 9.99999974E-6 : f32
    %16 = vector.broadcast %cst_9 : f32 to vector<1x64xf32>
    %17 = arith.addf %14, %16 : vector<1x64xf32>
    %18 = math.rsqrt %17 : vector<1x64xf32>
    %19 = arith.mulf %15, %18 : vector<1x64xf32>
    %20 = vector.broadcast %19 : vector<1x64xf32> to vector<8x64xf32>
    %21 = arith.mulf %9, %20 : vector<8x64xf32>
    %c0_10 = arith.constant 0 : index
    %c0_11 = arith.constant 0 : index
    %22 = vector.load %arg4[%c0_10, %c0_11] : memref<1x64xf32, #tpu.memory_space<vmem>>, vector<1x64xf32>
    %23 = vector.broadcast %22 : vector<1x64xf32> to vector<8x64xf32>
    %24 = arith.addf %21, %23 : vector<8x64xf32>
    %cst_12 = arith.constant 0.000000e+00 : f32
    %25 = vector.broadcast %cst_12 : f32 to vector<8x64xf32>
    %26 = arith.maximumf %24, %25 : vector<8x64xf32>
    %27 = arith.truncf %26 : vector<8x64xf32> to vector<8x64xbf16>
    %c0_13 = arith.constant 0 : index
    %c0_14 = arith.constant 0 : index
    %28 = vector.load %arg5[%c0_13, %c0_14] : memref<64x32xbf16, #tpu.memory_space<vmem>>, vector<64x32xbf16>
    %cst_15 = arith.constant dense<0.000000e+00> : vector<8x32xf32>
    %29 = tpu.matmul %27, %28, %cst_15 {dimension_numbers = #tpu.dot_dimension_numbers<[1], [0], [0], [1], [0, 0, 1, 1], [], []>} : vector<8x64xbf16>, vector<64x32xbf16>, vector<8x32xf32> -> vector<8x32xf32>
    %cst_16 = arith.constant dense<0.000000e+00> : vector<32xf32>
    %30 = vector.multi_reduction <add>, %29, %cst_16 [0] : vector<8x32xf32> to vector<32xf32>
    %31 = vector.shape_cast %30 : vector<32xf32> to vector<1x32xf32>
    %cst_17 = arith.constant 8.000000e+00 : f32
    %32 = vector.broadcast %cst_17 : f32 to vector<1x32xf32>
    %33 = arith.divf %31, %32 : vector<1x32xf32>
    %34 = vector.broadcast %33 : vector<1x32xf32> to vector<8x32xf32>
    %35 = arith.subf %29, %34 : vector<8x32xf32>
    %36 = arith.mulf %35, %35 : vector<8x32xf32>
    %cst_18 = arith.constant dense<0.000000e+00> : vector<32xf32>
    %37 = vector.multi_reduction <add>, %36, %cst_18 [0] : vector<8x32xf32> to vector<32xf32>
    %38 = vector.shape_cast %37 : vector<32xf32> to vector<1x32xf32>
    %cst_19 = arith.constant 8.000000e+00 : f32
    %39 = vector.broadcast %cst_19 : f32 to vector<1x32xf32>
    %40 = arith.divf %38, %39 : vector<1x32xf32>
    %c0_20 = arith.constant 0 : index
    %c0_21 = arith.constant 0 : index
    %41 = vector.load %arg6[%c0_20, %c0_21] : memref<1x32xf32, #tpu.memory_space<vmem>>, vector<1x32xf32>
    %cst_22 = arith.constant 9.99999974E-6 : f32
    %42 = vector.broadcast %cst_22 : f32 to vector<1x32xf32>
    %43 = arith.addf %40, %42 : vector<1x32xf32>
    %44 = math.rsqrt %43 : vector<1x32xf32>
    %45 = arith.mulf %41, %44 : vector<1x32xf32>
    %46 = vector.broadcast %45 : vector<1x32xf32> to vector<8x32xf32>
    %47 = arith.mulf %35, %46 : vector<8x32xf32>
    %c0_23 = arith.constant 0 : index
    %c0_24 = arith.constant 0 : index
    %48 = vector.load %arg7[%c0_23, %c0_24] : memref<1x32xf32, #tpu.memory_space<vmem>>, vector<1x32xf32>
    %49 = vector.broadcast %48 : vector<1x32xf32> to vector<8x32xf32>
    %50 = arith.addf %47, %49 : vector<8x32xf32>
    %cst_25 = arith.constant 0.000000e+00 : f32
    %51 = vector.broadcast %cst_25 : f32 to vector<8x32xf32>
    %52 = arith.maximumf %50, %51 : vector<8x32xf32>
    %53 = arith.truncf %52 : vector<8x32xf32> to vector<8x32xbf16>
    %c0_26 = arith.constant 0 : index
    %c0_27 = arith.constant 0 : index
    %54 = vector.load %arg8[%c0_26, %c0_27] : memref<32x1xbf16, #tpu.memory_space<vmem>>, vector<32x1xbf16>
    %cst_28 = arith.constant dense<0.000000e+00> : vector<8x1xf32>
    %55 = tpu.matmul %53, %54, %cst_28 {dimension_numbers = #tpu.dot_dimension_numbers<[1], [0], [0], [1], [0, 0, 1, 1], [], []>} : vector<8x32xbf16>, vector<32x1xbf16>, vector<8x1xf32> -> vector<8x1xf32>
    %c0_29 = arith.constant 0 : index
    %c0_30 = arith.constant 0 : index
    %56 = vector.load %arg9[%c0_29, %c0_30] : memref<1x1xf32, #tpu.memory_space<vmem>>, vector<1x1xf32>
    %57 = vector.broadcast %56 : vector<1x1xf32> to vector<8x1xf32>
    %58 = arith.addf %55, %57 : vector<8x1xf32>
    %cst_31 = arith.constant 0.000000e+00 : f32
    %59 = vector.broadcast %cst_31 : f32 to vector<8x1xf32>
    %60 = arith.subf %59, %58 : vector<8x1xf32>
    %61 = math.exp %60 : vector<8x1xf32>
    %cst_32 = arith.constant 1.000000e+00 : f32
    %62 = vector.broadcast %cst_32 : f32 to vector<8x1xf32>
    %63 = arith.addf %62, %61 : vector<8x1xf32>
    %cst_33 = arith.constant 1.000000e+00 : f32
    %64 = vector.broadcast %cst_33 : f32 to vector<8x1xf32>
    %65 = arith.divf %64, %63 : vector<8x1xf32>
    %c0_34 = arith.constant 0 : index
    %c0_35 = arith.constant 0 : index
    %66 = vector.load %arg10[%c0_34, %c0_35] : memref<8x1xf32, #tpu.memory_space<vmem>>, vector<8x1xf32>
    tpu.vector_store %arg10[%c0_34, %c0_35], %65 {strides = array<i32>} : memref<8x1xf32, #tpu.memory_space<vmem>>, vector<8x1xf32>,
    return
  }
  func.func @transform_0(%arg0: i32) -> (i32, i32) {
    %c0_i32 = arith.constant 0 : i32
    %c0_i32_0 = arith.constant 0 : i32
    %c0_i32_1 = arith.constant 0 : i32
    return %c0_i32, %c0_i32_0 : i32, i32
  }
  func.func @transform_1(%arg0: i32) -> (i32, i32) {
    %c0_i32 = arith.constant 0 : i32
    %c0_i32_0 = arith.constant 0 : i32
    %c0_i32_1 = arith.constant 0 : i32
    return %c0_i32, %c0_i32_0 : i32, i32
  }
  func.func @transform_2(%arg0: i32) -> (i32, i32) {
    %c0_i32 = arith.constant 0 : i32
    %c0_i32_0 = arith.constant 0 : i32
    %c0_i32_1 = arith.constant 0 : i32
    return %c0_i32, %c0_i32_0 : i32, i32
  }
  func.func @transform_3(%arg0: i32) -> (i32, i32) {
    %c0_i32 = arith.constant 0 : i32
    %c0_i32_0 = arith.constant 0 : i32
    %c0_i32_1 = arith.constant 0 : i32
    return %c0_i32, %c0_i32_0 : i32, i32
  }
  func.func @transform_4(%arg0: i32) -> (i32, i32) {
    %c0_i32 = arith.constant 0 : i32
    %c0_i32_0 = arith.constant 0 : i32
    %c0_i32_1 = arith.constant 0 : i32
    return %c0_i32, %c0_i32_0 : i32, i32
  }
  func.func @transform_5(%arg0: i32) -> (i32, i32) {
    %c0_i32 = arith.constant 0 : i32
    %c0_i32_0 = arith.constant 0 : i32
    %c0_i32_1 = arith.constant 0 : i32
    return %c0_i32, %c0_i32_0 : i32, i32
  }
  func.func @transform_6(%arg0: i32) -> (i32, i32) {
    %c0_i32 = arith.constant 0 : i32
    %c0_i32_0 = arith.constant 0 : i32
    %c0_i32_1 = arith.constant 0 : i32
    return %c0_i32, %c0_i32_0 : i32, i32
  }
  func.func @transform_7(%arg0: i32) -> (i32, i32) {
    %c0_i32 = arith.constant 0 : i32
    %c0_i32_0 = arith.constant 0 : i32
    %c0_i32_1 = arith.constant 0 : i32
    return %c0_i32, %c0_i32_0 : i32, i32
  }
  func.func @transform_8(%arg0: i32) -> (i32, i32) {
    %c0_i32 = arith.constant 0 : i32
    %c0_i32_0 = arith.constant 0 : i32
    %c0_i32_1 = arith.constant 0 : i32
    return %c0_i32, %c0_i32_0 : i32, i32
  }
  func.func @transform_9(%arg0: i32) -> (i32, i32) {
    %c0_i32 = arith.constant 0 : i32
    %c0_i32_0 = arith.constant 0 : i32
    %c0_i32_1 = arith.constant 0 : i32
    return %c0_i32, %c0_i32_0 : i32, i32
  }
}

</mosaic_0001>

<bundles_post_ra>
// kernel: discriminator_fc_forward.1
= control target key start
LH: loop header
LB: loop body
LE: loop exit
PB: predicated region body
PF: predicated region fallthrough
CT: control target
= control target key end

     0   :  { %vm53_vm0 = vcmask 261120   ;;  %v328_v4 = vmov 8.0   ;;  %vm70_vm1 = vcmask 523264   ;;  %vm265_vm12 = vcmask 7168   ;;  %s437_s1 = inlined_call_operand.vmem [shape: bf16[32,64], index: 1, kind: input, shape index: {}]   ;;  %s438_s0 = inlined_call_operand.vmem [shape: f32[8,32], index: 0, kind: input, shape index: {}]   ;;  %s439_s3 = inlined_call_operand.vmem [shape: f32[1,64], index: 3, kind: input, shape index: {}]   ;;  %s440_s4 = inlined_call_operand.vmem [shape: bf16[64,32], index: 4, kind: input, shape index: {}]   ;;  %s441_s2 = inlined_call_operand.vmem [shape: f32[1,64], index: 2, kind: input, shape index: {}]   ;;  %s442_s6 = inlined_call_operand.vmem [shape: f32[1,32], index: 6, kind: input, shape index: {}]   ;;  %s443_s7 = inlined_call_operand.vmem [shape: bf16[32,1], index: 7, kind: input, shape index: {}]   ;;  %s444_s8 = inlined_call_operand.<no memory space> [shape: f32[1,1], index: 8, kind: input, shape index: {}]   ;;  %s445_s5 = inlined_call_operand.vmem [shape: f32[1,32], index: 5, kind: input, shape index: {}]   ;;  %s446_s9 = inlined_call_operand.vmem [shape: f32[8,1], index: 9, kind: output, shape index: {}]  }
   0x1   :  { %v307_v0 = vld [vmem:[%s437_s1 + $0x8] sm:$0xff]  ;;  %v306_v1 = vld [vmem:[%s437_s1] sm:$0xff]  ;;  %318 = vrcp.f32 %v328_v4  ;;  %v311_v23 = vld [vmem:[%s440_s4 + $0x18] sm:$0xff] }
   0x2   :  { %63 = vmatpush.bf16.msra.mxu0 %v307_v0  ;;  %v35_v2 = vld [vmem:[%s438_s0] sm:$0xff]  ;;  %159 = vmatpush.bf16.msra.mxu1 %v311_v23  ;;  %v310_v26 = vld [vmem:[%s440_s4 + $0x10] sm:$0xff]  ;;  %v309_v29 = vld [vmem:[%s440_s4 + $0x8] sm:$0xff] }
   0x3   :  { %v36_v3 = vpack.c.bf16 %v35_v2, %v35_v2  ;;  %v308_v31 = vld [vmem:[%s440_s4] sm:$0xff] }
   0x4   :  { %v96_v41 = vld [vmem:[%s441_s2] sm:$0x1] }
   0x5   :  { %v315_v46 = vld [vmem:[%s439_s3] ss:$0 sm:$0xff] }
   0x6   :  { %64 = vmatpush.bf16.msra.mxu0 %v306_v1  ;;  %160 = vmatpush.bf16.msra.mxu1 %v310_v26 }
   0x7   :  { %v319_v5 = vpop.eup %318 }
   0x8   :  { %v79_v6 = vmul.f32 8.0, %v319_v5  ;;  %vm83_vm2 = vweird.f32 %v319_v5 }
   0x9   :  { %279 = vmatmul.msk.bf16.vlgmr.msra.gmra.mxu0 %vm53_vm0, %v36_v3  ;;  %v313_v3 = vld [vmem:[%s443_s7 + $0x8] sm:$0xff] }
   0xa   :  { %v80_v7 = vsub.f32 1.0, %v79_v6  ;;  %161 = vmatpush.bf16.msra.mxu1 %v309_v29  ;;  %239 = vmatpush.bf16.msra.mxu2 %v313_v3 }
   0xc   :  { %v81_v11 = vmul.f32 %v319_v5, %v80_v7 }
   0xe   :  { %v82_v14 = vadd.f32 %v319_v5, %v81_v11  ;;  %162 = vmatpush.bf16.msra.mxu1 %v308_v31 }
  0x10   :  { %v390_v18 = vsel %vm83_vm2, %v319_v5, %v82_v14  ;;  %v312_v5 = vld [vmem:[%s443_s7] sm:$0xff] }
  0x11   :  { %240 = vmatpush.bf16.msra.mxu2 %v312_v5 }
  0x86   :  { %v66_v8 = vpop.f32.mrf.mxu0 }
  0x87   :  { %v71_v9 = vsel %vm70_vm1, %v66_v8, 0.0 }
  0x88   :  { %v72_v10 = vrot.slane %v71_v9, 4 }
  0x8a   :  { %v73_v12 = vadd.f32 %v72_v10, %v71_v9  ;;  %v14_v10 = vstv %s444_s8 }
  0x8b   :  { %15 = vst [vmem:[#allocation2] sm:$0x1] %v14_v10 }
  0x8c   :  { %v74_v13 = vrot.slane %v73_v12, 2 }
  0x8e   :  { %v75_v15 = vadd.f32 %v74_v13, %v73_v12  ;;  %v68_v16 = vpop.f32.mrf.mxu0 }
  0x8f   :  { %v186_v16 = vld [vmem:[%s445_s5] sm:$0x1] }
  0x90   :  { %v76_v17 = vrot.slane %v75_v15, 1 }
  0x92   :  { %v77_v19 = vadd.f32 %v76_v17, %v75_v15  ;;  %v317_v26 = vld [vmem:[#allocation2] ss:$0 sm:$0xff] }
  0x94   :  { %v85_v20 = vmul.f32 %v390_v18, %v77_v19 }
  0x96   :  { %v86_v21 = vsub.f32 %v66_v8, %v85_v20 }
  0x98   :  { %v87_v22 = vmul.f32 %v86_v21, %v86_v21 }
  0x9a   :  { %v88_v24 = vsel %vm70_vm1, %v87_v22, 0.0 }
  0x9b   :  { %v89_v25 = vrot.slane %v88_v24, 4 }
  0x9d   :  { %v90_v27 = vadd.f32 %v89_v25, %v88_v24 }
  0x9f   :  { %v91_v28 = vrot.slane %v90_v27, 2 }
  0xa1   :  { %v92_v30 = vadd.f32 %v91_v28, %v90_v27 }
  0xa3   :  { %v93_v32 = vrot.slane %v92_v30, 1 }
  0xa5   :  { %v94_v33 = vadd.f32 %v93_v32, %v92_v30 }
  0xa7   :  { %v95_v34 = vmul.f32 %v94_v33, %v390_v18 }
  0xa9   :  { %v97_v35 = vadd.f32 1e-05, %v95_v34 }
  0xab   :  { %320 = vrsqrt.f32 %v97_v35  ;;  %vm104_vm4 = vweird.f32 %v97_v35 }
  0xb1   :  { %v321_v36 = vpop.eup %320 }
  0xb2   :  { %v99_v37 = vmul.f32 %v321_v36, %v97_v35  ;;  %vm105_vm3 = vweird.f32 %v321_v36 }
  0xb3   :  { %vm106_vm5 = vmor %vm104_vm4, %vm105_vm3 }
  0xb4   :  { %v100_v38 = vmul.f32 %v321_v36, %v99_v37 }
  0xb6   :  { %v101_v39 = vmul.f32 0.5, %v100_v38 }
  0xb8   :  { %v102_v40 = vsub.f32 1.5, %v101_v39 }
  0xba   :  { %v103_v42 = vmul.f32 %v321_v36, %v102_v40 }
  0xbc   :  { %v107_v43 = vsel %vm106_vm5, %v321_v36, %v103_v42 }
  0xbd   :  { %v108_v44 = vmul.f32 %v107_v43, %v96_v41 }
  0xbf   :  { %v110_v45 = vperm.slane %v108_v44, 0 }
  0xc1   :  { %v112_v47 = vmul.f32 %v110_v45, %v86_v21  ;;  %v316_v21 = vld [vmem:[%s442_s6] ss:$0 sm:$0xff] }
  0xc3   :  { %v117_v48 = vadd.f32 %v315_v46, %v112_v47 }
  0xc5   :  { %v118_v49 = vmax.f32 %v117_v48, 0.0 }
  0xc7   :  { %v119_v50 = vpack.c.bf16 %v118_v49, %v118_v49 }
  0xc9   :  { %296 = vmatmul.msk.bf16.vlgmr.msra.gmra.mxu1 %vm70_vm1, %v119_v50 }
 0x146   :  { %v164_v51 = vpop.f32.mrf.mxu1 }
 0x147   :  { %v168_v52 = vsel %vm53_vm0, %v164_v51, 0.0 }
 0x148   :  { %v169_v53 = vrot.slane %v168_v52, 4 }
 0x14a   :  { %v170_v54 = vadd.f32 %v169_v53, %v168_v52 }
 0x14c   :  { %v171_v55 = vrot.slane %v170_v54, 2 }
 0x14e   :  { %v172_v56 = vadd.f32 %v171_v55, %v170_v54  ;;  %v166_v57 = vpop.f32.mrf.mxu1 }
 0x150   :  { %v173_v58 = vrot.slane %v172_v56, 1 }
 0x152   :  { %v174_v59 = vadd.f32 %v173_v58, %v172_v56 }
 0x154   :  { %v175_v60 = vmul.f32 %v174_v59, %v390_v18 }
 0x156   :  { %v176_v61 = vsub.f32 %v164_v51, %v175_v60 }
 0x158   :  { %v177_v62 = vmul.f32 %v176_v61, %v176_v61 }
 0x15a   :  { %v178_v63 = vsel %vm53_vm0, %v177_v62, 0.0 }
 0x15b   :  { %v179_v0 = vrot.slane %v178_v63, 4 }
 0x15d   :  { %v180_v1 = vadd.f32 %v179_v0, %v178_v63 }
 0x15f   :  { %v181_v2 = vrot.slane %v180_v1, 2 }
 0x161   :  { %v182_v4 = vadd.f32 %v181_v2, %v180_v1 }
 0x163   :  { %v183_v6 = vrot.slane %v182_v4, 1 }
 0x165   :  { %v184_v7 = vadd.f32 %v183_v6, %v182_v4 }
 0x167   :  { %v185_v8 = vmul.f32 %v184_v7, %v390_v18 }
 0x169   :  { %v187_v9 = vadd.f32 1e-05, %v185_v8 }
 0x16b   :  { %322 = vrsqrt.f32 %v187_v9  ;;  %vm194_vm7 = vweird.f32 %v187_v9 }
 0x171   :  { %v323_v11 = vpop.eup %322 }
 0x172   :  { %v189_v12 = vmul.f32 %v323_v11, %v187_v9  ;;  %vm195_vm6 = vweird.f32 %v323_v11 }
 0x173   :  { %vm196_vm8 = vmor %vm194_vm7, %vm195_vm6 }
 0x174   :  { %v190_v13 = vmul.f32 %v323_v11, %v189_v12 }
 0x176   :  { %v191_v14 = vmul.f32 0.5, %v190_v13 }
 0x178   :  { %v192_v15 = vsub.f32 1.5, %v191_v14 }
 0x17a   :  { %v193_v17 = vmul.f32 %v323_v11, %v192_v15 }
 0x17c   :  { %v197_v18 = vsel %vm196_vm8, %v323_v11, %v193_v17 }
 0x17d   :  { %v198_v19 = vmul.f32 %v197_v18, %v186_v16 }
 0x17f   :  { %v200_v20 = vperm.slane %v198_v19, 0 }
 0x181   :  { %v202_v22 = vmul.f32 %v200_v20, %v176_v61 }
 0x183   :  { %v207_v23 = vadd.f32 %v316_v21, %v202_v22 }
 0x185   :  { %v208_v24 = vmax.f32 %v207_v23, 0.0 }
 0x187   :  { %v209_v25 = vpack.c.bf16 %v208_v24, %v208_v24 }
 0x189   :  { %305 = vmatmul.msk.bf16.vlgmr.msra.gmra.mxu2 %vm53_vm0, %v209_v25 }
 0x20c   :  { %v242_v27 = vpop.f32.mrf.mxu2 }
 0x20d   :  { %v243_v28 = vadd.f32 %v317_v26, %v242_v27 }
 0x20f   :  { %v246_v29 = vsub.f32 0.0, %v243_v28 }
 0x211   :  { %v247_v30 = vmul.f32 1.442695, %v246_v29 }
 0x213   :  { %324 = vpow2.f32 %v247_v30 }
 0x214   :  { %v244_v31 = vpop.f32.mrf.mxu2 }
 0x219   :  { %v325_v32 = vpop.eup %324 }
 0x21a   :  { %v249_v33 = vadd.f32 1.0, %v325_v32 }
 0x21c   :  { %326 = vrcp.f32 %v249_v33  ;;  %v261_v37 = vand.u32 2147483648, %v249_v33  ;;  %v259_v39 = vand.u32 2147483647, %v249_v33  ;;  %vm255_vm10 = vweird.f32 %v249_v33 }
 0x21e   :  { %v262_v41 = vor.u32 1.1754944e-38, %v261_v37  ;;  %vm260_vm13 = vcmp.eq.f32.partialorder %v259_v39, 8.507059e+37 }
 0x222   :  { %v327_v34 = vpop.eup %326 }
 0x223   :  { %v251_v35 = vmul.f32 %v327_v34, %v249_v33  ;;  %vm256_vm9 = vweird.f32 %v327_v34 }
 0x224   :  { %vm257_vm11 = vmor %vm255_vm10, %vm256_vm9 }
 0x225   :  { %v252_v36 = vsub.f32 1.0, %v251_v35 }
 0x227   :  { %v253_v38 = vmul.f32 %v327_v34, %v252_v36 }
 0x229   :  { %v254_v40 = vadd.f32 %v327_v34, %v253_v38 }
 0x22b   :  { %v258_v42 = vsel %vm257_vm11, %v327_v34, %v254_v40 }
 0x22c   :  { %v263_v43 = vsel %vm260_vm13, %v262_v41, %v258_v42 }
 0x22d   :  { %266 = vst.msk [vmem:[%s446_s9] sm:$0xff] %vm265_vm12, %v263_v43 }

</bundles_post_ra>
